<compile_context>
chip_gen: v7x
topology: tpu7x:2x2x1
jax: 0.10.0
libtpu: 0.0.40
codegen_flags: <defaults>
</compile_context>

<pallas_src>
import jax
import jax.numpy as jnp
from jax.experimental import pallas as pl
from jax.experimental.pallas import tpu as pltpu

SCALE_DIM = 6144          # hard-coded in the PyTorch module __init__
INIT_VALUE = 0.001


def scale_kernel(x_ref, s_ref, o_ref):
    # x_ref: (tile_m, 6144), s_ref: (1, 6144) f32 -> broadcast multiply on VPU.
    x = x_ref[...].astype(jnp.float32)
    o_ref[...] = (x * s_ref[...]).astype(o_ref.dtype)


def _round_up(n, m):
    return ((n + m - 1) // m) * m


def _sublane_min(dtype):
    itemsize = jnp.dtype(dtype).itemsize
    if itemsize >= 4:
        return 8
    if itemsize == 2:
        return 16
    return 32


def _hw_budget():
    """(max_tile_m, vmem_limit_bytes) sized to this chip's VMEM."""
    try:
        vmem_bytes = pltpu.get_tpu_info().vmem_capacity_bytes
    except Exception:
        vmem_bytes = 64 * 1024 * 1024  # conservative fallback
    if vmem_bytes <= 64 * 1024 * 1024:
        # v7x: 64 MiB per TensorCore. 384-row f32 blocks = 9 MiB;
        # 2x double-buffered (in + out) = 36 MiB, under a 48 MiB limit.
        return 384, 48 * 1024 * 1024
    # v5e / v6e: 128 MiB VMEM. 512-row f32 blocks = 12 MiB; 4 bufs = 48 MiB.
    return 512, 56 * 1024 * 1024


def _pick_tile_m(m_rows, dtype, max_tile_m):
    """Largest sublane-aligned row tile <= max_tile_m, while guaranteeing at
    least 2 grid steps whenever M allows it (keeps both v7x TCs busy)."""
    sub = _sublane_min(dtype)
    if m_rows >= 2 * max_tile_m:
        return max_tile_m
    half = _round_up(pl.cdiv(m_rows, 2), sub)
    return max(sub, min(max_tile_m, half))


def scale_layer(x, scale, *, donate_input=False):
    """x: (..., 6144), scale: (6144,) f32 -> x * scale (broadcast over last axis)."""
    orig_shape = x.shape
    assert orig_shape[-1] == SCALE_DIM, "feature dim must be 6144"

    x2d = x.reshape(-1, SCALE_DIM)
    m_rows = x2d.shape[0]
    itemsize = jnp.dtype(x2d.dtype).itemsize

    max_tile_m, vmem_limit = _hw_budget()
    tile_m = _pick_tile_m(m_rows, x2d.dtype, max_tile_m)
    grid_m = pl.cdiv(m_rows, tile_m)     # ragged last block handled by Pallas

    # Parameter stays f32 (PyTorch promotion semantics); upcast happens in-kernel.
    scale2d = scale.reshape(1, SCALE_DIM).astype(jnp.float32)

    cost = pl.CostEstimate(
        flops=m_rows * SCALE_DIM,
        transcendentals=0,
        bytes_accessed=2 * m_rows * SCALE_DIM * itemsize + SCALE_DIM * 4,
    )

    kwargs = {}
    if donate_input:
        # Caller promises x is dead after this call: write the result in place.
        kwargs["input_output_aliases"] = {0: 0}

    out = pl.pallas_call(
        scale_kernel,
        out_shape=jax.ShapeDtypeStruct((m_rows, SCALE_DIM), x2d.dtype),
        grid_spec=pltpu.PrefetchScalarGridSpec(
            num_scalar_prefetch=0,
            grid=(grid_m,),
            in_specs=[
                # x: one (tile_m, 6144) lane-dense slab per grid step.
                pl.BlockSpec((tile_m, SCALE_DIM), lambda i: (i, 0)),
                # scale: same (1, 6144) block every step -> stays resident.
                pl.BlockSpec((1, SCALE_DIM), lambda i: (0, 0)),
            ],
            out_specs=pl.BlockSpec((tile_m, SCALE_DIM), lambda i: (i, 0)),
        ),
        compiler_params=pltpu.CompilerParams(
            dimension_semantics=("parallel",),
            vmem_limit_bytes=vmem_limit,
        ),
        cost_estimate=cost,
        **kwargs,
    )(x2d, scale2d)

    return out.reshape(orig_shape)


if __name__ == "__main__":
    key = jax.random.PRNGKey(0)

    # Deterministic parameter init, exactly as the PyTorch module does.
    scale = jnp.full((SCALE_DIM,), INIT_VALUE, dtype=jnp.float32)

    # Small batch/seq; the feature dim must be 6144 to match the module.
    B, S = 2, 8
    x = jax.random.normal(key, (B, S, SCALE_DIM), dtype=jnp.float32)

    y = scale_layer(x, scale)
    jax.block_until_ready(y)

    y_ref = x * scale
    assert y.shape == x.shape and y.dtype == x.dtype
    assert jnp.allclose(y, y_ref, rtol=1e-6, atol=1e-6)

    # Ragged-M path (21 rows, not a multiple of the tile): exercises the
    # masked last block with no wrapper-side pad/slice.
    x2 = jax.random.normal(jax.random.PRNGKey(1), (3, 7, SCALE_DIM),
                           dtype=jnp.float32)
    y2 = scale_layer(x2, scale)
    jax.block_until_ready(y2)
    assert jnp.allclose(y2, x2 * scale, rtol=1e-6, atol=1e-6)

    print("KERNEL_OK")
</pallas_src>

<mosaic_0001>
module attributes {stable_mosaic.version = 11 : i64} {
  func.func @scale_kernel(%arg0: i32, %arg1: memref<8x6144xf32, #tpu.memory_space<vmem>>, %arg2: memref<1x6144xf32, #tpu.memory_space<vmem>>, %arg3: memref<8x6144xf32, #tpu.memory_space<vmem>>) attributes {dimension_semantics = [#tpu.dimension_semantics<parallel>], iteration_bounds = array<i64: 2>, scalar_prefetch = 0 : i64, scratch_operands = 0 : i64, tpu.core_type = #tpu.core_type<tc>, window_params = [{transform_indices = @transform_0, window_bounds = array<i64: 8, 6144>}, {pipeline_mode = #tpu.pipeline_mode<synchronous>, transform_indices = @transform_1, window_bounds = array<i64: 1, 6144>}, {transform_indices = @transform_2, window_bounds = array<i64: 8, 6144>}]} {
    %c0 = arith.constant 0 : index
    %c0_0 = arith.constant 0 : index
    %0 = vector.load %arg1[%c0, %c0_0] : memref<8x6144xf32, #tpu.memory_space<vmem>>, vector<8x6144xf32>
    %c0_1 = arith.constant 0 : index
    %c0_2 = arith.constant 0 : index
    %1 = vector.load %arg2[%c0_1, %c0_2] : memref<1x6144xf32, #tpu.memory_space<vmem>>, vector<1x6144xf32>
    %2 = vector.broadcast %1 : vector<1x6144xf32> to vector<8x6144xf32>
    %3 = arith.mulf %0, %2 : vector<8x6144xf32>
    %c0_3 = arith.constant 0 : index
    %c0_4 = arith.constant 0 : index
    %4 = vector.load %arg3[%c0_3, %c0_4] : memref<8x6144xf32, #tpu.memory_space<vmem>>, vector<8x6144xf32>
    tpu.vector_store %arg3[%c0_3, %c0_4], %3 {strides = array<i32>} : memref<8x6144xf32, #tpu.memory_space<vmem>>, vector<8x6144xf32>,
    return
  }
  func.func @transform_0(%arg0: i32) -> (i32, i32) {
    %c0_i32 = arith.constant 0 : i32
    %c0_i32_0 = arith.constant 0 : i32
    return %arg0, %c0_i32 : i32, i32
  }
  func.func @transform_1(%arg0: i32) -> (i32, i32) {
    %c0_i32 = arith.constant 0 : i32
    %c0_i32_0 = arith.constant 0 : i32
    %c0_i32_1 = arith.constant 0 : i32
    return %c0_i32, %c0_i32_0 : i32, i32
  }
  func.func @transform_2(%arg0: i32) -> (i32, i32) {
    %c0_i32 = arith.constant 0 : i32
    %c0_i32_0 = arith.constant 0 : i32
    return %arg0, %c0_i32 : i32, i32
  }
}

</mosaic_0001>

<bundles_post_ra>
// kernel: tpu_custom_call.1
= control target key start
LH: loop header
LB: loop body
LE: loop exit
PB: predicated region body
PF: predicated region fallthrough
CT: control target
= control target key end

     0   :  { %7 = vsyncpa [#allocation3], 0  ;;  %s1255_s0 = inlined_call_operand.hbm [shape: f32[16,6144], index: 0, kind: input, shape index: {}]   ;;  %s1256_s1 = inlined_call_operand.hbm [shape: f32[1,6144], index: 1, kind: input, shape index: {}]   ;;  %s1257_s2 = inlined_call_operand.hbm [shape: f32[16,6144], index: 2, kind: output, shape index: {}]  }
   0x1   :  { %9 = vsyncpa [#allocation3 + $0x1], 0 }
   0x2   :  { %10 = vsyncpa [#allocation6], 0 }
   0x3   :  { %11 = vsyncpa [#allocation4], 0 }
   0x4   :  { %13 = vsyncpa [#allocation4 + $0x1], 0  ;;  %s883_s9 = smov 0   ;;  %s885_s10 = smov 0  }
   0x5   :  { %s887_s11 = smov 0   ;;  %s889_s12 = smov 0  }
   0x6 LB: > { %s904_s13 = sadd.s32 4294967295, %s863_s12   ;;  %s664_s14 = sadd.s32 4294967294, %s863_s12   ;;  %s863_s12 = sphi %s889_s12, %s1281_s12   ;;  %s859_s11 = sphi %s887_s11, %s1280_s11   ;;  %s855_s10 = sphi %s885_s10, %s1279_s10   ;;  %s851_s9 = sphi %s883_s9, %s1278_s9  }
   0x7   : > { %p39_p0 = scmp.ne.s32.totalorder %s855_s10, %s851_s9  ;;  %p1258_p1 = scmp.eq.s32.totalorder %s904_s13, 0 }
   0x8   : > { %p90_p3 = scmp.eq.s32.totalorder %s664_s14, 1  ;;  %p665_p5 = scmp.ge.s32.totalorder %s863_s12, 1 }
   0x9   : > { %p913_p4 = por %p1258_p1, %p39_p0  ;;  %p97_p7 = scmp.lt.s32.totalorder %s863_s12, 3 }
   0xa   : > { %p918_p6 = por %p90_p3, %p39_p0  ;;  %s865_s18 = smov [#allocation5]  }
   0xb   : > { %s1261_s15 = scalar_select %p913_p4, 1, 0 }
   0xc   : > { %s1262_s16 = scalar_select %p918_p6, 1, 0 }
   0xd   : > { %p923_p8 = pnand %p665_p5, %p97_p7  ;;  %s110_s19 = sshll.u32 %s865_s18, 4  ;;  %s111_s19 = int_to_ptr.vmem [resolvable:$true] %s110_s19 }
   0xe   : > { %s931_s20 = sadd.s32 1, %s863_s12   ;;  %s26_s24 = sadd.s32 1, %s859_s11 }
   0xf   : > { %s1263_s17 = scalar_select %p923_p8, 1, 0 }
  0x10   : > { %p686_p10 = pneg %p923_p8  ;;  %s23_s22 = ssub.s32 %s863_s12, %s931_s20 }
  0x11   : > { %p941_p12 = scmp.eq.s32.totalorder %s23_s22, 0  ;;  %s735_s27 = scalar_lea.hbm %s1256_s1, 768 }
  0x12   : > { %p935_p11 = pnand %p686_p10, %p1258_p1  ;;  %p736_p0 = scmp.ne.s32.totalorder %s1256_s1, %s735_s27 }
  0x13   : > { %s1265_s23 = scalar_select %p941_p12, 1, 0 }
  0x14   : > { %p737_p3 = pneg %p935_p11  ;;  %p742_p10 = scmp.lt.u32.totalorder %s735_s27, %s1256_s1 }
  0x16   : > { %p738_p5 = pnand %p737_p3, %p736_p0 }
  0x18   : > { %p739_p7 = pneg %p738_p5 }
  0x1a   : > { %p744_p9 = pnand %p742_p10, %p739_p7 }
  0x1c   : > { %747 = shalt.err (!%p744_p9)
}
  0x1d   : > { %s748_s4 = scalar_lea.vmem %s111_s19, 768  ;;  %p756_p6 = scmp.lt.s32.totalorder %s111_s19, %s111_s19 }
  0x1e   : > { %p749_p1 = scmp.ne.s32.totalorder %s111_s19, %s748_s4  ;;  %p757_p4 = scmp.lt.s32.totalorder %s748_s4, %s748_s4 }
  0x20   : > { %p751_p2 = pnand %p749_p1, %p737_p3  ;;  %p758_p8 = por %p757_p4, %p756_p6 }
  0x22   : > { %p752_p13 = pneg %p751_p2 }
  0x24   : > { %p759_p12 = pnand %p758_p8, %p752_p13 }
  0x26   : > { %762 = shalt.err (!%p759_p12)
}
  0x27   : > { %689 = dma.hbm_to_vmem [thread:$0]  (!%p935_p11), %s1256_s1, 768, %s111_s19, [#allocation6]  }
  0x28   : > { %p1266_p1 = scmp.ne.s32.totalorder %s1265_s23, 0  ;;  %p34_p2 = scmp.eq.s32.totalorder %s863_s12, 0 }
  0x29   : > { %p1267_p4 = scmp.ne.s32.totalorder %s859_s11, %s855_s10  ;;  %p1268_p6 = scmp.eq.s32.totalorder %s904_s13, 1 }
  0x2a   : > { %s967_s7 = scalar_select %p1266_p1, %s859_s11, %s26_s24  }
  0x2b   : > { %p975_p8 = por %p1268_p6, %p1267_p4  ;;  %p699_p9 = scmp.lt.s32.totalorder %s863_s12, 2 }
  0x2c   : > { %s121_s14 = sand.u32 1, %s859_s11   ;;  %p1270_p12 = pmov %p1267_p4 }
  0x2d   : > { %s674_s18 = smul.u32 384, %s121_s14  ;;  %s122_s27 = scalar_lea.sflag [#allocation3], %s121_s14 }
  0x2e   : > { %p35_p13 = por %p34_p2, %p1270_p12  ;;  %s675_s21 = smul.u32 6144, %s863_s12 }
  0x2f   : > { %s125_s25 = scalar_lea.vmem [#allocation2], %s674_s18  ;;  %s768_s3 = scalar_lea.hbm %s1255_s0, 12288 }
  0x30   : > { %p985_p0 = pnand %p699_p9, %p35_p13  ;;  %s992_s24 = scalar_lea.hbm %s1255_s0, %s675_s21 }
  0x31   : > { %s133_s26 = sshll.u32 %s125_s25, 4  ;;  %s763_s28 = scalar_lea.hbm %s992_s24, 6144  ;;  %s994_s26 = int_to_ptr.vmem [resolvable:$true] %s133_s26 }
  0x32   : > { %p764_p11 = scmp.ne.s32.totalorder %s992_s24, %s763_s28  ;;  %p765_p3 = pneg %p985_p0 }
  0x33   : > { %p769_p10 = scmp.lt.u32.totalorder %s992_s24, %s1255_s0  ;;  %p770_p1 = scmp.lt.u32.totalorder %s768_s3, %s763_s28 }
  0x34   : > { %p766_p5 = pnand %p765_p3, %p764_p11  ;;  %p772_p4 = scmp.lt.u32.totalorder %s763_s28, %s992_s24 }
  0x35   : > { %p771_p2 = por %p770_p1, %p769_p10 }
  0x36   : > { %p767_p7 = pneg %p766_p5 }
  0x37   : > { %p773_p6 = por %p772_p4, %p771_p2 }
  0x39   : > { %p774_p9 = pnand %p773_p6, %p767_p7 }
  0x3b   : > { %777 = shalt.err (!%p774_p9)
}
  0x3c   : > { %s778_s6 = scalar_lea.vmem %s994_s26, 6144  ;;  %s866_s14 = smov [#allocation2]  }
  0x3d   : > { %p779_p12 = scmp.ne.s32.totalorder %s994_s26, %s778_s6  ;;  %s783_s18 = sshll.u32 %s866_s14, 4  ;;  %s784_s18 = int_to_ptr.vmem [resolvable:$false] %s783_s18 }
  0x3e   : > { %s785_s21 = scalar_lea.vmem %s784_s18, 12288  ;;  %p786_p5 = scmp.lt.s32.totalorder %s994_s26, %s784_s18 }
  0x3f   : > { %p781_p13 = pnand %p779_p12, %p765_p3  ;;  %p787_p10 = scmp.lt.s32.totalorder %s785_s21, %s778_s6 }
  0x41   : > { %p782_p11 = pneg %p781_p13  ;;  %p788_p1 = por %p787_p10, %p786_p5 }
  0x43   : > { %p789_p2 = pnand %p788_p1, %p782_p11 }
  0x45   : > { %792 = shalt.err (!%p789_p2)
}
  0x46   : > { %693 = dma.hbm_to_vmem [thread:$0]  (!%p985_p0), %s992_s24, 6144, %s994_s26, %s122_s27  }
  0x47   : > { %p1272_p7 = scmp.ne.s32.totalorder %s1263_s17, 0 }
  0x48   : > { %s1024_s19 = sand.u32 (!%p1272_p7), 1, %s855_s10   ;;  %p1273_p3 = scmp.ne.s32.totalorder (!%p1272_p7), %s1261_s15, 0 }
  0x49   : > { %142 = sbr.rel (%p1272_p7) target bundleno = 135 (0x87), region = 28  ;;  %s145_s25 = scalar_lea.sflag (!%p1272_p7), [#allocation3], %s1024_s19 }
  0x4a   : > { %s676_s23 = smul.u32 (!%p1272_p7), 384, %s1024_s19 }
  0x4c   : > { %s1030_s28 = scalar_lea.vmem (!%p1272_p7), [#allocation2], %s676_s23 }
  0x50   : > { %838 = dma.done.wait (%p1273_p3), %s145_s25, 6144  }
  0x51   : > { %840 = vsyncadd (%p1273_p3), %s145_s25, 4294961152  ;;  %p1274_p0 = scmp.eq.s32.totalorder %s904_s13, 0 }
  0x53   : > { %842 = dma.done.wait (%p1274_p0), [#allocation6], 768   ;;  %p1275_p4 = pmov %p1274_p0 }
  0x54   : > { %v233_v0 = vlaneseq  ;;  %v173_v10 = vld [vmem:[%s1030_s28] sm:$0xff]  ;;  %v174_v12 = vld [vmem:[%s1030_s28 + $0x8] sm:$0xff]  ;;  %v175_v15 = vld [vmem:[%s1030_s28 + $0x10] sm:$0xff]  ;;  %s1079_s15 = scalar_lea.vmem [#allocation7], %s676_s23  ;;  %s677_s17 = smul.u32 6144, %s904_s13 }
  0x55   : > { %844 = vsyncadd (%p1275_p4), [#allocation6], 4294966528  ;;  %v221_v11 = vld [vmem:[#allocation5] sm:$0xff]  ;;  %v176_v17 = vld [vmem:[%s1030_s28 + $0x18] sm:$0xff]  ;;  %s584_s22 = sshll.u32 %s1079_s15, 4  ;;  %s570_s29 = scalar_lea.sflag [#allocation4], %s1024_s19  ;;  %s1205_s22 = int_to_ptr.vmem [resolvable:$true] %s584_s22 }
  0x56   : > { %v234_v1 = vshrl.u32 %v233_v0, 7  ;;  %v177_v19 = vld [vmem:[%s1030_s28 + $0x20] sm:$0xff]  ;;  %v178_v21 = vld [vmem:[%s1030_s28 + $0x28] sm:$0xff]  ;;  %v179_v23 = vld [vmem:[%s1030_s28 + $0x30] sm:$0xff]  ;;  %s1203_s27 = scalar_lea.hbm %s1257_s2, %s677_s17  ;;  %s793_s13 = scalar_lea.vmem %s1205_s22, 6144 }
  0x57   : > { %v180_v25 = vld [vmem:[%s1030_s28 + $0x38] sm:$0xff]  ;;  %v181_v31 = vld [vmem:[%s1030_s28 + $0x40] sm:$0xff]  ;;  %v222_v32 = vld [vmem:[#allocation5 + $0x8] sm:$0xff]  ;;  %p794_p6 = scmp.ne.s32.totalorder %s1205_s22, %s793_s13  ;;  %s867_s30 = smov [#allocation7]  }
  0x58   : > { %v1040_v2 = vsub.s32 0, %v234_v1  ;;  %v1042_v3 = vsub.s32 1, %v234_v1  ;;  %v1044_v4 = vsub.s32 2, %v234_v1  ;;  %v1046_v5 = vsub.s32 3, %v234_v1  ;;  %v182_v33 = vld [vmem:[%s1030_s28 + $0x48] sm:$0xff]  ;;  %v183_v38 = vld [vmem:[%s1030_s28 + $0x50] sm:$0xff] }
  0x59   : > { %v1048_v6 = vsub.s32 4, %v234_v1  ;;  %v1050_v7 = vsub.s32 5, %v234_v1  ;;  %v1052_v8 = vsub.s32 6, %v234_v1  ;;  %v1054_v9 = vsub.s32 7, %v234_v1  ;;  %v184_v39 = vld [vmem:[%s1030_s28 + $0x58] sm:$0xff]  ;;  %v185_v40 = vld [vmem:[%s1030_s28 + $0x60] sm:$0xff]  ;;  %p795_p9 = pnand %p794_p6, %p975_p8 }
  0x5a   : > { %v236_v13 = vrot.slane %v221_v11, %v1040_v2  ;;  %v240_v14 = vrot.slane %v221_v11, %v1042_v3  ;;  %v244_v16 = vrot.slane %v221_v11, %v1044_v4  ;;  %v248_v18 = vrot.slane %v221_v11, %v1046_v5  ;;  %v186_v45 = vld [vmem:[%s1030_s28 + $0x68] sm:$0xff]  ;;  %v187_v46 = vld [vmem:[%s1030_s28 + $0x70] sm:$0xff]  ;;  %v188_v47 = vld [vmem:[%s1030_s28 + $0x78] sm:$0xff]  ;;  %s797_s3 = sshll.u32 %s867_s30, 4  ;;  %s798_s3 = int_to_ptr.vmem [resolvable:$false] %s797_s3 }
  0x5b   : > { %v252_v20 = vrot.slane %v221_v11, %v1048_v6  ;;  %v256_v22 = vrot.slane %v221_v11, %v1050_v7  ;;  %v260_v24 = vrot.slane %v221_v11, %v1052_v8  ;;  %v264_v26 = vrot.slane %v221_v11, %v1054_v9  ;;  %v223_v52 = vld [vmem:[#allocation5 + $0x10] sm:$0xff]  ;;  %v189_v57 = vld [vmem:[%s1030_s28 + $0x80] sm:$0xff]  ;;  %v190_v58 = vld [vmem:[%s1030_s28 + $0x88] sm:$0xff]  ;;  %p796_p12 = pneg %p795_p9  ;;  %s799_s4 = scalar_lea.vmem %s798_s3, 12288 }
  0x5c   : > { %v473_v27 = vmul.f32 %v236_v13, %v173_v10  ;;  %v474_v28 = vmul.f32 %v240_v14, %v174_v12  ;;  %v475_v29 = vmul.f32 %v244_v16, %v175_v15  ;;  %v476_v30 = vmul.f32 %v248_v18, %v176_v17  ;;  %v191_v63 = vld [vmem:[%s1030_s28 + $0x90] sm:$0xff]  ;;  %v192_v0 = vld [vmem:[%s1030_s28 + $0x98] sm:$0xff]  ;;  %v193_v1 = vld [vmem:[%s1030_s28 + $0xa0] sm:$0xff]  ;;  %p800_p13 = scmp.lt.s32.totalorder %s1205_s22, %s798_s3  ;;  %p801_p11 = scmp.lt.s32.totalorder %s799_s4, %s793_s13 }
  0x5d   : > { %v477_v34 = vmul.f32 %v252_v20, %v177_v19  ;;  %v478_v35 = vmul.f32 %v256_v22, %v178_v21  ;;  %v479_v36 = vmul.f32 %v260_v24, %v179_v23  ;;  %v480_v37 = vmul.f32 %v264_v26, %v180_v25  ;;  %v194_v14 = vld [vmem:[%s1030_s28 + $0xa8] sm:$0xff]  ;;  %v195_v15 = vld [vmem:[%s1030_s28 + $0xb0] sm:$0xff]  ;;  %v196_v16 = vld [vmem:[%s1030_s28 + $0xb8] sm:$0xff] }
  0x5e   : > { %521 = vst [vmem:[%s1079_s15] sm:$0xff] %v473_v27  ;;  %522 = vst [vmem:[%s1079_s15 + $0x8] sm:$0xff] %v474_v28  ;;  %v268_v41 = vrot.slane %v222_v32, %v1040_v2  ;;  %v272_v42 = vrot.slane %v222_v32, %v1042_v3  ;;  %v276_v43 = vrot.slane %v222_v32, %v1044_v4  ;;  %v224_v21 = vld [vmem:[#allocation5 + $0x18] sm:$0xff]  ;;  %v197_v26 = vld [vmem:[%s1030_s28 + $0xc0] sm:$0xff]  ;;  %p802_p5 = por %p801_p11, %p800_p13 }
  0x5f   : > { %523 = vst [vmem:[%s1079_s15 + $0x10] sm:$0xff] %v475_v29  ;;  %524 = vst [vmem:[%s1079_s15 + $0x18] sm:$0xff] %v476_v30  ;;  %v280_v44 = vrot.slane %v222_v32, %v1046_v5  ;;  %v284_v48 = vrot.slane %v222_v32, %v1048_v6  ;;  %v288_v49 = vrot.slane %v222_v32, %v1050_v7  ;;  %v198_v27 = vld [vmem:[%s1030_s28 + $0xc8] sm:$0xff] }
  0x60   : > { %525 = vst [vmem:[%s1079_s15 + $0x20] sm:$0xff] %v477_v34  ;;  %526 = vst [vmem:[%s1079_s15 + $0x28] sm:$0xff] %v478_v35  ;;  %v292_v50 = vrot.slane %v222_v32, %v1052_v8  ;;  %v296_v51 = vrot.slane %v222_v32, %v1054_v9  ;;  %v481_v53 = vmul.f32 %v268_v41, %v181_v31  ;;  %v199_v32 = vld [vmem:[%s1030_s28 + $0xd0] sm:$0xff]  ;;  %v201_v34 = vld [vmem:[%s1030_s28 + $0xe0] sm:$0xff]  ;;  %p803_p10 = pnand %p802_p5, %p796_p12 }
  0x61   : > { %527 = vst [vmem:[%s1079_s15 + $0x30] sm:$0xff] %v479_v36  ;;  %528 = vst [vmem:[%s1079_s15 + $0x38] sm:$0xff] %v480_v37  ;;  %v482_v54 = vmul.f32 %v272_v42, %v182_v33  ;;  %v483_v55 = vmul.f32 %v276_v43, %v183_v38  ;;  %v484_v56 = vmul.f32 %v280_v44, %v184_v39  ;;  %v200_v33 = vld [vmem:[%s1030_s28 + $0xd8] sm:$0xff]  ;;  %v202_v39 = vld [vmem:[%s1030_s28 + $0xe8] sm:$0xff] }
  0x62   : > { %v485_v59 = vmul.f32 %v284_v48, %v185_v40  ;;  %v486_v60 = vmul.f32 %v288_v49, %v186_v45  ;;  %v487_v61 = vmul.f32 %v292_v50, %v187_v46  ;;  %v488_v62 = vmul.f32 %v296_v51, %v188_v47  ;;  %529 = vst [vmem:[%s1079_s15 + $0x40] sm:$0xff] %v481_v53  ;;  %v203_v40 = vld [vmem:[%s1030_s28 + $0xf0] sm:$0xff]  ;;  %v204_v41 = vld [vmem:[%s1030_s28 + $0xf8] sm:$0xff]  ;;  %v225_v46 = vld [vmem:[#allocation5 + $0x20] sm:$0xff] }
  0x63   : > { %530 = vst [vmem:[%s1079_s15 + $0x48] sm:$0xff] %v482_v54  ;;  %531 = vst [vmem:[%s1079_s15 + $0x50] sm:$0xff] %v483_v55  ;;  %v300_v10 = vrot.slane %v223_v52, %v1040_v2  ;;  %v304_v11 = vrot.slane %v223_v52, %v1042_v3  ;;  %v308_v12 = vrot.slane %v223_v52, %v1044_v4  ;;  %v205_v51 = vld [vmem:[%s1030_s28 + $0x100] sm:$0xff] }
  0x64   : > { %532 = vst [vmem:[%s1079_s15 + $0x58] sm:$0xff] %v484_v56  ;;  %v312_v13 = vrot.slane %v223_v52, %v1046_v5  ;;  %533 = vst [vmem:[%s1079_s15 + $0x60] sm:$0xff] %v485_v59  ;;  %v316_v17 = vrot.slane %v223_v52, %v1048_v6  ;;  %v320_v18 = vrot.slane %v223_v52, %v1050_v7  ;;  %v209_v59 = vld [vmem:[%s1030_s28 + $0x120] sm:$0xff] }
  0x65   : > { %534 = vst [vmem:[%s1079_s15 + $0x68] sm:$0xff] %v486_v60  ;;  %535 = vst [vmem:[%s1079_s15 + $0x70] sm:$0xff] %v487_v61  ;;  %v324_v19 = vrot.slane %v223_v52, %v1052_v8  ;;  %v328_v20 = vrot.slane %v223_v52, %v1054_v9  ;;  %v489_v22 = vmul.f32 %v300_v10, %v189_v57  ;;  %v206_v52 = vld [vmem:[%s1030_s28 + $0x108] sm:$0xff]  ;;  %v207_v57 = vld [vmem:[%s1030_s28 + $0x110] sm:$0xff] }
  0x66   : > { %536 = vst [vmem:[%s1079_s15 + $0x78] sm:$0xff] %v488_v62  ;;  %v490_v23 = vmul.f32 %v304_v11, %v190_v58  ;;  %v491_v24 = vmul.f32 %v308_v12, %v191_v63  ;;  %v492_v25 = vmul.f32 %v312_v13, %v192_v0  ;;  %v493_v28 = vmul.f32 %v316_v17, %v193_v1  ;;  %v208_v58 = vld [vmem:[%s1030_s28 + $0x118] sm:$0xff]  ;;  %v210_v0 = vld [vmem:[%s1030_s28 + $0x128] sm:$0xff]  ;;  %v211_v1 = vld [vmem:[%s1030_s28 + $0x130] sm:$0xff] }
  0x67   : > { %v494_v29 = vmul.f32 %v320_v18, %v194_v14  ;;  %v495_v30 = vmul.f32 %v324_v19, %v195_v15  ;;  %v496_v31 = vmul.f32 %v328_v20, %v196_v16  ;;  %537 = vst [vmem:[%s1079_s15 + $0x80] sm:$0xff] %v489_v22  ;;  %v332_v35 = vrot.slane %v224_v21, %v1040_v2  ;;  %v212_v10 = vld [vmem:[%s1030_s28 + $0x138] sm:$0xff]  ;;  %v226_v15 = vld [vmem:[#allocation5 + $0x28] sm:$0xff]  ;;  %v213_v20 = vld [vmem:[%s1030_s28 + $0x140] sm:$0xff] }
  0x68   : > { %538 = vst [vmem:[%s1079_s15 + $0x88] sm:$0xff] %v490_v23  ;;  %539 = vst [vmem:[%s1079_s15 + $0x90] sm:$0xff] %v491_v24  ;;  %v336_v36 = vrot.slane %v224_v21, %v1042_v3  ;;  %v340_v37 = vrot.slane %v224_v21, %v1044_v4  ;;  %v344_v38 = vrot.slane %v224_v21, %v1046_v5 }
  0x69   : > { %540 = vst [vmem:[%s1079_s15 + $0x98] sm:$0xff] %v492_v25  ;;  %541 = vst [vmem:[%s1079_s15 + $0xa0] sm:$0xff] %v493_v28  ;;  %v348_v42 = vrot.slane %v224_v21, %v1048_v6  ;;  %v352_v43 = vrot.slane %v224_v21, %v1050_v7  ;;  %v356_v44 = vrot.slane %v224_v21, %v1052_v8  ;;  %v217_v28 = vld [vmem:[%s1030_s28 + $0x160] sm:$0xff] }
  0x6a   : > { %542 = vst [vmem:[%s1079_s15 + $0xa8] sm:$0xff] %v494_v29  ;;  %543 = vst [vmem:[%s1079_s15 + $0xb0] sm:$0xff] %v495_v30  ;;  %v360_v45 = vrot.slane %v224_v21, %v1054_v9  ;;  %v497_v47 = vmul.f32 %v332_v35, %v197_v26  ;;  %v498_v48 = vmul.f32 %v336_v36, %v198_v27  ;;  %v214_v21 = vld [vmem:[%s1030_s28 + $0x148] sm:$0xff]  ;;  %v215_v26 = vld [vmem:[%s1030_s28 + $0x150] sm:$0xff] }
  0x6b   : > { %544 = vst [vmem:[%s1079_s15 + $0xb8] sm:$0xff] %v496_v31  ;;  %v499_v49 = vmul.f32 %v340_v37, %v199_v32  ;;  %v500_v50 = vmul.f32 %v344_v38, %v200_v33  ;;  %v501_v53 = vmul.f32 %v348_v42, %v201_v34  ;;  %v502_v54 = vmul.f32 %v352_v43, %v202_v39  ;;  %v216_v27 = vld [vmem:[%s1030_s28 + $0x158] sm:$0xff]  ;;  %v218_v33 = vld [vmem:[%s1030_s28 + $0x168] sm:$0xff]  ;;  %v219_v34 = vld [vmem:[%s1030_s28 + $0x170] sm:$0xff] }
  0x6c   : > { %v503_v55 = vmul.f32 %v356_v44, %v203_v40  ;;  %v504_v56 = vmul.f32 %v360_v45, %v204_v41  ;;  %545 = vst [vmem:[%s1079_s15 + $0xc0] sm:$0xff] %v497_v47  ;;  %546 = vst [vmem:[%s1079_s15 + $0xc8] sm:$0xff] %v498_v48  ;;  %v364_v60 = vrot.slane %v225_v46, %v1040_v2  ;;  %v220_v35 = vld [vmem:[%s1030_s28 + $0x178] sm:$0xff] }
  0x6d   : > { %547 = vst [vmem:[%s1079_s15 + $0xd0] sm:$0xff] %v499_v49  ;;  %548 = vst [vmem:[%s1079_s15 + $0xd8] sm:$0xff] %v500_v50  ;;  %v368_v61 = vrot.slane %v225_v46, %v1042_v3  ;;  %v372_v62 = vrot.slane %v225_v46, %v1044_v4  ;;  %v376_v63 = vrot.slane %v225_v46, %v1046_v5 }
  0x6e   : > { %549 = vst [vmem:[%s1079_s15 + $0xe0] sm:$0xff] %v501_v53  ;;  %550 = vst [vmem:[%s1079_s15 + $0xe8] sm:$0xff] %v502_v54  ;;  %v380_v11 = vrot.slane %v225_v46, %v1048_v6  ;;  %v384_v12 = vrot.slane %v225_v46, %v1050_v7  ;;  %v388_v13 = vrot.slane %v225_v46, %v1052_v8 }
  0x6f   : > { %551 = vst [vmem:[%s1079_s15 + $0xf0] sm:$0xff] %v503_v55  ;;  %552 = vst [vmem:[%s1079_s15 + $0xf8] sm:$0xff] %v504_v56  ;;  %v392_v14 = vrot.slane %v225_v46, %v1054_v9  ;;  %v505_v16 = vmul.f32 %v364_v60, %v205_v51  ;;  %v506_v17 = vmul.f32 %v368_v61, %v206_v52 }
  0x70   : > { %v507_v18 = vmul.f32 %v372_v62, %v207_v57  ;;  %v508_v19 = vmul.f32 %v376_v63, %v208_v58  ;;  %v509_v22 = vmul.f32 %v380_v11, %v209_v59  ;;  %v510_v23 = vmul.f32 %v384_v12, %v210_v0 }
  0x71   : > { %v511_v24 = vmul.f32 %v388_v13, %v211_v1  ;;  %v512_v25 = vmul.f32 %v392_v14, %v212_v10  ;;  %553 = vst [vmem:[%s1079_s15 + $0x100] sm:$0xff] %v505_v16  ;;  %554 = vst [vmem:[%s1079_s15 + $0x108] sm:$0xff] %v506_v17  ;;  %v396_v29 = vrot.slane %v226_v15, %v1040_v2 }
  0x72   : > { %555 = vst [vmem:[%s1079_s15 + $0x110] sm:$0xff] %v507_v18  ;;  %556 = vst [vmem:[%s1079_s15 + $0x118] sm:$0xff] %v508_v19  ;;  %v400_v30 = vrot.slane %v226_v15, %v1042_v3  ;;  %v404_v31 = vrot.slane %v226_v15, %v1044_v4  ;;  %v408_v32 = vrot.slane %v226_v15, %v1046_v5 }
  0x73   : > { %557 = vst [vmem:[%s1079_s15 + $0x120] sm:$0xff] %v509_v22  ;;  %558 = vst [vmem:[%s1079_s15 + $0x128] sm:$0xff] %v510_v23  ;;  %v412_v36 = vrot.slane %v226_v15, %v1048_v6  ;;  %v416_v2 = vrot.slane %v226_v15, %v1050_v7  ;;  %v420_v3 = vrot.slane %v226_v15, %v1052_v8 }
  0x74   : > { %559 = vst [vmem:[%s1079_s15 + $0x130] sm:$0xff] %v511_v24  ;;  %560 = vst [vmem:[%s1079_s15 + $0x138] sm:$0xff] %v512_v25  ;;  %v424_v4 = vrot.slane %v226_v15, %v1054_v9  ;;  %v513_v5 = vmul.f32 %v396_v29, %v213_v20  ;;  %v514_v37 = vmul.f32 %v400_v30, %v214_v21 }
  0x75   : > { %v515_v38 = vmul.f32 %v404_v31, %v215_v26  ;;  %v516_v39 = vmul.f32 %v408_v32, %v216_v27  ;;  %v517_v40 = vmul.f32 %v412_v36, %v217_v28  ;;  %v518_v41 = vmul.f32 %v416_v2, %v218_v33 }
  0x76   : > { %v519_v6 = vmul.f32 %v420_v3, %v219_v34  ;;  %v520_v42 = vmul.f32 %v424_v4, %v220_v35  ;;  %561 = vst [vmem:[%s1079_s15 + $0x140] sm:$0xff] %v513_v5  ;;  %562 = vst [vmem:[%s1079_s15 + $0x148] sm:$0xff] %v514_v37 }
  0x77   : > { %563 = vst [vmem:[%s1079_s15 + $0x150] sm:$0xff] %v515_v38  ;;  %564 = vst [vmem:[%s1079_s15 + $0x158] sm:$0xff] %v516_v39 }
  0x78   : > { %565 = vst [vmem:[%s1079_s15 + $0x160] sm:$0xff] %v517_v40  ;;  %566 = vst [vmem:[%s1079_s15 + $0x168] sm:$0xff] %v518_v41 }
  0x79   : > { %567 = vst [vmem:[%s1079_s15 + $0x170] sm:$0xff] %v519_v6  ;;  %568 = vst [vmem:[%s1079_s15 + $0x178] sm:$0xff] %v520_v42 }
  0x7a   : > { %806 = shalt.err (!%p803_p10)
}
  0x7b   : > { %s807_s5 = scalar_lea.hbm %s1203_s27, 6144  ;;  %s811_s18 = scalar_lea.hbm %s1257_s2, 12288 }
  0x7c   : > { %p808_p1 = scmp.ne.s32.totalorder %s1203_s27, %s807_s5  ;;  %p812_p3 = scmp.lt.u32.totalorder %s1203_s27, %s1257_s2 }
  0x7d   : > { %p813_p0 = scmp.lt.u32.totalorder %s811_s18, %s807_s5  ;;  %p815_p6 = scmp.lt.u32.totalorder %s807_s5, %s1203_s27 }
  0x7e   : > { %p809_p2 = pnand %p808_p1, %p975_p8 }
  0x7f   : > { %p814_p4 = por %p813_p0, %p812_p3 }
  0x80   : > { %p810_p7 = pneg %p809_p2 }
  0x81   : > { %p816_p9 = por %p815_p6, %p814_p4 }
  0x83   : > { %p817_p12 = pnand %p816_p9, %p810_p7 }
  0x85   : > { %820 = shalt.err (!%p817_p12)
}
  0x86   : > { %684 = dma.vmem_to_hbm [thread:$0]  (%p975_p8), %s1205_s22, 6144, %s1203_s27, %s570_s29  }
  0x87 PF: > { %s596_s23 = sand.u32 1, %s851_s9   ;;  %p1276_p13 = scmp.ne.s32.totalorder %s1262_s16, 0 }
  0x88   : > { %p1277_p11 = scmp.ge.s32.totalorder %s863_s12, 2  ;;  %s597_s25 = scalar_lea.sflag [#allocation4], %s596_s23 }
  0x8a   : > { %p695_p5 = pnand %p1277_p11, %p1276_p13 }
  0x8c   : > { %846 = dma.done.wait (!%p695_p5), %s597_s25, 6144  }
  0x8d   : > { %848 = vsyncadd (!%p695_p5), %s597_s25, 4294961152  ;;  %p16_p10 = scmp.ge.s32.totalorder %s931_s20, 4   ;;  %s1278_s9 = smov %s855_s10 }
  0x8e   : > { %s1279_s10 = smov %s859_s11  ;;  %s1280_s11 = smov %s967_s7 }
  0x8f   : > { %s1281_s12 = smov %s931_s20  ;;  %18 = sbr.rel (!%p16_p10) target bundleno = 6 (0x6), region = 77 }
  0x96   :  { %602 = vsyncpa [#allocation3], 1 }
  0x97   :  { %604 = vsyncpa [#allocation3 + $0x1], 1 }
  0x98   :  { %605 = vsyncpa [#allocation6], 1 }
  0x99   :  { %606 = vsyncpa [#allocation4], 1 }
  0x9a   :  { %608 = vsyncpa [#allocation4 + $0x1], 1 }

</bundles_post_ra>
